<compile_context>
chip_gen: v6e
topology: v6e:2x2x1
jax: 0.10.0
libtpu: 0.0.40
codegen_flags: <defaults>
</compile_context>

<pallas_src>
import jax
import jax.numpy as jnp
from jax.experimental import pallas as pl
from jax.experimental.pallas import tpu as pltpu

_LANE = 128


def _round_up(v, m):
    return ((v + m - 1) // m) * m


def _vmem_capacity_bytes():
    """Physical VMEM of the current TPU generation (conservative fallback)."""
    try:
        info = pltpu.get_tpu_info()
        cap = getattr(info, "vmem_capacity_bytes", None)
        if cap:
            return int(cap)
    except Exception:
        pass
    return 64 * 1024 * 1024  # v7x has the smallest VMEM; safe lower bound.


def _two_layer_kernel(x_ref, w1_ref, b1_ref, w2_ref, b2_ref, o_ref):
    # Layer 1: MXU matmul at the operands' dtype (bf16 or f32), f32 accumulation.
    h = jnp.dot(x_ref[...], w1_ref[...], preferred_element_type=jnp.float32)
    h = jnp.tanh(h + b1_ref[...])                  # bias-add (VPU) + tanh (EUP) in f32
    # Layer 2: feed the MXU in the weights' dtype (no-op cast in the f32 build).
    y = jnp.dot(h.astype(w2_ref.dtype), w2_ref[...],
                preferred_element_type=jnp.float32)
    y = jnp.tanh(y + b2_ref[...])                  # b2 padded lanes give tanh(0) = 0
    o_ref[...] = y.astype(o_ref.dtype)


def make_two_layer_net(w1, b1, w2, b2, *,
                       compute_dtype=jnp.bfloat16,
                       batch_tile=None,
                       x_buffer_count=None,
                       single_buffer_weights=None,
                       return_padded=False):
    """Prepare parameters once and return a jitted forward f(x) -> (N, D_out).

    w1: (D_in, H)   b1: (H,)   w2: (H, D_out)   b2: (D_out,)
    (w1/w2 are the transposes of the PyTorch nn.Linear weight matrices.)
    """
    D_in, H = w1.shape
    D_out = w2.shape[1]
    D_out_p = _round_up(D_out, _LANE)
    pad_cols = D_out_p - D_out

    # --- one-time parameter prep (hoisted out of the per-call hot path) -------
    w2_p = jnp.pad(w2, ((0, 0), (0, pad_cols))) if pad_cols else w2
    b2_p = jnp.pad(b2, (0, pad_cols)) if pad_cols else b2
    w1_c = jnp.asarray(w1, compute_dtype)
    w2_c = jnp.asarray(w2_p, compute_dtype)
    b1_2d = jnp.asarray(b1, jnp.float32).reshape(1, H)       # biases stay f32
    b2_2d = jnp.asarray(b2_p, jnp.float32).reshape(1, D_out_p)

    w_item = jnp.dtype(compute_dtype).itemsize
    weight_bytes = (w1_c.size + w2_c.size) * w_item + (b1_2d.size + b2_2d.size) * 4
    # Single-buffer the resident weights only once double-buffering them would
    # waste meaningful VMEM (>4 MiB); tiny demo weights keep the default path.
    sbw = (weight_bytes > (4 << 20)) if single_buffer_weights is None \
        else bool(single_buffer_weights)

    vmem_cap = _vmem_capacity_bytes()
    vmem_budget = max(32 << 20, min((vmem_cap * 3) // 4, 96 << 20))
    sub = max(8, 32 // w_item)            # sublane multiple: 8 f32, 16 bf16, 32 fp8

    def fwd(x):
        assert x.ndim == 2 and x.shape[1] == D_in
        N = x.shape[0]
        out_dtype = x.dtype
        xc = x.astype(compute_dtype)

        cost = pl.CostEstimate(
            flops=int(2 * N * (D_in * H + H * D_out)),
            transcendentals=int(N * (H + D_out)),
            bytes_accessed=int(xc.size * w_item + weight_bytes
                               + N * D_out_p * jnp.dtype(out_dtype).itemsize),
        )
        out_shape = jax.ShapeDtypeStruct((N, D_out_p), out_dtype)
        args = (xc, w1_c, b1_2d, w2_c, b2_2d)

        if N < 16:
            # Tiny batch: grid-free call, every operand a single VMEM-resident
            # block -> no pipeline prologue/epilogue or per-step bookkeeping.
            vmem_spec = pl.BlockSpec(memory_space=pltpu.MemorySpace.VMEM)
            out_p = pl.pallas_call(
                _two_layer_kernel,
                out_shape=out_shape,
                in_specs=[vmem_spec] * 5,
                out_specs=vmem_spec,
                cost_estimate=cost,
            )(*args)
        else:
            # Batch-tiled grid; weights/biases stay resident across all steps.
            n_xbuf = x_buffer_count if x_buffer_count is not None else 2
            w_foot = weight_bytes * (1 if sbw else 2)
            stream_budget = max(vmem_budget - w_foot - (4 << 20), 1 << 20)
            row_bytes = (D_in * w_item * n_xbuf
                         + D_out_p * jnp.dtype(out_dtype).itemsize * 2)
            if batch_tile is None:
                tn = stream_budget // row_bytes
                tn = min(tn, 2048)                              # >2048 has no ROI
                tn = min(tn, _round_up(pl.cdiv(N, 2), sub))     # >=2 blocks for v7x's 2 TCs
                tn = max(sub, (tn // sub) * sub)
            else:
                # Validate/round a user-supplied tile: must be a multiple of the
                # sublane packing (or it would fail the (8,128) block constraint).
                tn = max(sub, min(_round_up(batch_tile, sub), _round_up(N, sub)))
            grid = (pl.cdiv(N, tn),)
            vmem_limit = int(min(max(w_foot + tn * row_bytes + (4 << 20), 32 << 20),
                                 vmem_budget))

            def _resident(shape):
                if sbw:
                    # Constant index_map never re-fetches -> one buffer is enough.
                    return pl.BlockSpec(shape, lambda i: (0, 0),
                                        pipeline_mode=pl.Buffered(1))
                return pl.BlockSpec(shape, lambda i: (0, 0))

            if x_buffer_count is None:
                x_spec = pl.BlockSpec((tn, D_in), lambda i: (i, 0))
            else:   # e.g. Buffered(3) on v6e if the x stream shows exposed DMA
                x_spec = pl.BlockSpec((tn, D_in), lambda i: (i, 0),
                                      pipeline_mode=pl.Buffered(x_buffer_count))

            out_p = pl.pallas_call(
                _two_layer_kernel,
                out_shape=out_shape,
                grid_spec=pltpu.PrefetchScalarGridSpec(
                    num_scalar_prefetch=0,
                    grid=grid,
                    in_specs=[x_spec,
                              _resident((D_in, H)),
                              _resident((1, H)),
                              _resident((H, D_out_p)),
                              _resident((1, D_out_p))],
                    out_specs=pl.BlockSpec((tn, D_out_p), lambda i: (i, 0)),
                ),
                compiler_params=pltpu.CompilerParams(
                    # Independent batch axis: lets v7x shard it across its two
                    # TensorCores; neutral on single-TC v5e/v6e.
                    dimension_semantics=("parallel",),
                    vmem_limit_bytes=vmem_limit,
                ),
                cost_estimate=cost,
            )(*args)

        if return_padded or pad_cols == 0:
            return out_p
        # Slice stays inside this jit so XLA fuses it with the kernel output.
        return out_p[:, :D_out]

    return jax.jit(fwd)


if __name__ == "__main__":
    # Shapes implied by TwoLayerNet(D_in, H, D_out) acting on (N, D_in) input.
    N, D_in, H, D_out = 8, 32, 64, 16

    key = jax.random.PRNGKey(0)
    kx, kw1, kb1, kw2, kb2 = jax.random.split(key, 5)

    x = jax.random.normal(kx, (N, D_in), dtype=jnp.float32)
    # Deterministic init mimicking nn.Linear's uniform(-1/sqrt(fan_in), 1/sqrt(fan_in)).
    lim1 = 1.0 / (D_in ** 0.5)
    lim2 = 1.0 / (H ** 0.5)
    w1 = jax.random.uniform(kw1, (D_in, H), jnp.float32, -lim1, lim1)
    b1 = jax.random.uniform(kb1, (H,), jnp.float32, -lim1, lim1)
    w2 = jax.random.uniform(kw2, (H, D_out), jnp.float32, -lim2, lim2)
    b2 = jax.random.uniform(kb2, (D_out,), jnp.float32, -lim2, lim2)

    ref_fn = lambda xv: jnp.tanh(jnp.tanh(xv @ w1 + b1) @ w2 + b2)

    # 1) Exact-precision build (f32): small batch -> grid-free path.
    net_f32 = make_two_layer_net(w1, b1, w2, b2, compute_dtype=jnp.float32)
    out = jax.block_until_ready(net_f32(x))
    assert out.shape == (N, D_out)
    assert jnp.allclose(out, ref_fn(x), atol=1e-5, rtol=1e-5)

    # 2) f32, larger batch -> batch-tiled (>=2 "parallel" blocks) grid path.
    x_big = jax.random.normal(jax.random.PRNGKey(1), (256, D_in), jnp.float32)
    out_big = jax.block_until_ready(net_f32(x_big))
    assert out_big.shape == (256, D_out)
    assert jnp.allclose(out_big, ref_fn(x_big), atol=1e-5, rtol=1e-5)

    # 3) Production build (default bf16 MXU inputs, f32 accumulation/bias/tanh).
    net_bf16 = make_two_layer_net(w1, b1, w2, b2)
    out_bf = jax.block_until_ready(net_bf16(x_big))
    assert out_bf.shape == (256, D_out)
    assert jnp.allclose(out_bf, ref_fn(x_big), atol=3e-2, rtol=3e-2)

    print("KERNEL_OK")
</pallas_src>

<mosaic_0001>
module attributes {stable_mosaic.version = 11 : i64} {
  func.func @_two_layer_kernel(%arg0: memref<8x32xf32, #tpu.memory_space<vmem>>, %arg1: memref<32x64xf32, #tpu.memory_space<vmem>>, %arg2: memref<1x64xf32, #tpu.memory_space<vmem>>, %arg3: memref<64x128xf32, #tpu.memory_space<vmem>>, %arg4: memref<1x128xf32, #tpu.memory_space<vmem>>, %arg5: memref<8x128xf32, #tpu.memory_space<vmem>>) attributes {dimension_semantics = [], scalar_prefetch = 0 : i64, scratch_operands = 0 : i64, tpu.core_type = #tpu.core_type<tc>} {
    %c0 = arith.constant 0 : index
    %c0_0 = arith.constant 0 : index
    %0 = vector.load %arg0[%c0, %c0_0] : memref<8x32xf32, #tpu.memory_space<vmem>>, vector<8x32xf32>
    %c0_1 = arith.constant 0 : index
    %c0_2 = arith.constant 0 : index
    %1 = vector.load %arg1[%c0_1, %c0_2] : memref<32x64xf32, #tpu.memory_space<vmem>>, vector<32x64xf32>
    %cst = arith.constant dense<0.000000e+00> : vector<8x64xf32>
    %2 = tpu.matmul %0, %1, %cst {dimension_numbers = #tpu.dot_dimension_numbers<[1], [0], [0], [1], [0, 0, 1, 1], [], []>} : vector<8x32xf32>, vector<32x64xf32>, vector<8x64xf32> -> vector<8x64xf32>
    %c0_3 = arith.constant 0 : index
    %c0_4 = arith.constant 0 : index
    %3 = vector.load %arg2[%c0_3, %c0_4] : memref<1x64xf32, #tpu.memory_space<vmem>>, vector<1x64xf32>
    %4 = vector.broadcast %3 : vector<1x64xf32> to vector<8x64xf32>
    %5 = arith.addf %2, %4 : vector<8x64xf32>
    %6 = math.tanh %5 : vector<8x64xf32>
    %c0_5 = arith.constant 0 : index
    %c0_6 = arith.constant 0 : index
    %7 = vector.load %arg3[%c0_5, %c0_6] : memref<64x128xf32, #tpu.memory_space<vmem>>, vector<64x128xf32>
    %cst_7 = arith.constant dense<0.000000e+00> : vector<8x128xf32>
    %8 = tpu.matmul %6, %7, %cst_7 {dimension_numbers = #tpu.dot_dimension_numbers<[1], [0], [0], [1], [0, 0, 1, 1], [], []>} : vector<8x64xf32>, vector<64x128xf32>, vector<8x128xf32> -> vector<8x128xf32>
    %c0_8 = arith.constant 0 : index
    %c0_9 = arith.constant 0 : index
    %9 = vector.load %arg4[%c0_8, %c0_9] : memref<1x128xf32, #tpu.memory_space<vmem>>, vector<1x128xf32>
    %10 = vector.broadcast %9 : vector<1x128xf32> to vector<8x128xf32>
    %11 = arith.addf %8, %10 : vector<8x128xf32>
    %12 = math.tanh %11 : vector<8x128xf32>
    %c0_10 = arith.constant 0 : index
    %c0_11 = arith.constant 0 : index
    %13 = vector.load %arg5[%c0_10, %c0_11] : memref<8x128xf32, #tpu.memory_space<vmem>>, vector<8x128xf32>
    tpu.vector_store %arg5[%c0_10, %c0_11], %12 {strides = array<i32>} : memref<8x128xf32, #tpu.memory_space<vmem>>, vector<8x128xf32>,
    return
  }
}

</mosaic_0001>

<bundles_post_ra>
// kernel: fwd.1
= control target key start
LH: loop header
LB: loop body
LE: loop exit
PB: predicated region body
PF: predicated region fallthrough
CT: control target
= control target key end

     0   :  { %10 = vsyncpa [#allocation3], 0  ;;  %s456_s0 = inlined_call_operand.hbm [shape: f32[8,32], index: 0, kind: input, shape index: {}]   ;;  %s457_s1 = inlined_call_operand.hbm [shape: f32[32,64], index: 1, kind: input, shape index: {}]   ;;  %s458_s2 = inlined_call_operand.vmem [shape: f32[1,64], index: 2, kind: input, shape index: {}]   ;;  %s459_s3 = inlined_call_operand.hbm [shape: f32[64,128], index: 3, kind: input, shape index: {}]   ;;  %s460_s4 = inlined_call_operand.vmem [shape: f32[1,128], index: 4, kind: input, shape index: {}]   ;;  %s461_s5 = inlined_call_operand.hbm [shape: f32[8,128], index: 5, kind: output, shape index: {}]  }
   0x1   :  { %11 = vsyncpa [#allocation6], 0 }
   0x2   :  { %12 = vsyncpa [#allocation4], 0  ;;  %s400_s18 = smov [#allocation5]  }
   0x3   :  { %s28_s19 = sshll.u32 %s400_s18, 4  ;;  %s29_s19 = int_to_ptr.vmem [resolvable:$true] %s28_s19 }
   0x4   :  { %s322_s20 = scalar_lea.vmem %s29_s19, 512  ;;  %p327_p1 = scmp.lt.s32.totalorder %s29_s19, %s29_s19 }
   0x5   :  { %p323_p0 = scmp.ne.s32.totalorder %s29_s19, %s322_s20  ;;  %p328_p2 = scmp.lt.s32.totalorder %s322_s20, %s322_s20 }
   0x7   :  { %p329_p3 = por %p328_p2, %p327_p1 }
   0x9   :  { %p330_p4 = pnand %p329_p3, %p323_p0 }
   0xb   :  { %333 = shalt.err (!%p330_p4)
}
   0xc   :  { %s401_s21 = smov 128   ;;  %s402_s22 = smov 8  }
   0xd   :  { %34 = dma.hbm_to_vmem [thread:$0]  %s457_s1, 512, %s29_s19, [#allocation6], %s401_s21, %s401_s21, %s402_s22  }
   0xe   :  { %s403_s25 = smov [#allocation2]   ;;  %s404_s27 = smov [#allocation7]  }
   0xf   :  { %s19_s26 = sshll.u32 %s403_s25, 4  ;;  %s42_s28 = sshll.u32 %s404_s27, 4  ;;  %s20_s26 = int_to_ptr.vmem [resolvable:$true] %s19_s26  ;;  %s43_s28 = int_to_ptr.vmem [resolvable:$true] %s42_s28 }
  0x10   :  { %s342_s29 = scalar_lea.vmem %s20_s26, 128  ;;  %p347_p6 = scmp.lt.s32.totalorder %s20_s26, %s20_s26 }
  0x11   :  { %p343_p5 = scmp.ne.s32.totalorder %s20_s26, %s342_s29  ;;  %p348_p7 = scmp.lt.s32.totalorder %s342_s29, %s342_s29 }
  0x13   :  { %p349_p8 = por %p348_p7, %p347_p6 }
  0x15   :  { %p350_p9 = pnand %p349_p8, %p343_p5 }
  0x17   :  { %353 = shalt.err (!%p350_p9)
}
  0x18   :  { %22 = dma.hbm_to_vmem [thread:$0]  %s456_s0, 128, %s20_s26, [#allocation3]  }
  0x19   :  { %s362_s7 = scalar_lea.vmem %s43_s28, 1024  ;;  %p367_p11 = scmp.lt.s32.totalorder %s43_s28, %s43_s28 }
  0x1a   :  { %p363_p10 = scmp.ne.s32.totalorder %s43_s28, %s362_s7  ;;  %p368_p12 = scmp.lt.s32.totalorder %s362_s7, %s362_s7 }
  0x1c   :  { %p369_p13 = por %p368_p12, %p367_p11 }
  0x1e   :  { %p370_p0 = pnand %p369_p13, %p363_p10 }
  0x20   :  { %373 = shalt.err (!%p370_p0)
}
  0x21   :  { %48 = dma.hbm_to_vmem [thread:$0]  %s459_s3, 1024, %s43_s28, [#allocation6], %s401_s21, %s401_s21, %s402_s22  }
  0x22   :  { %394 = dma.done.wait [#allocation3], 128  }
  0x23   :  { %395 = vsyncadd [#allocation3], 4294967168 }
  0x24   :  { %396 = dma.done.wait [#allocation6], 1536  }
  0x25   :  { %397 = vsyncadd [#allocation6], 4294965760  ;;  %v405_v0 = vmov 0.0   ;;  %vm406_vm0 = vmmov 0   ;;  %v64_v1 = vld [vmem:[#allocation5 + $0x18] sm:$0xff]  ;;  %v63_v2 = vld [vmem:[#allocation5 + $0x10] sm:$0xff] }
  0x26   :  { %272 = vmatprep.subr.mxu0 %v405_v0  ;;  %280 = vmatprep.mubr.msk.f32.mxu0 %vm406_vm0, %v405_v0  ;;  %v62_v3 = vld [vmem:[#allocation5 + $0x8] sm:$0xff]  ;;  %v61_v4 = vld [vmem:[#allocation5] sm:$0xff]  ;;  %v60_v5 = vld [vmem:[#allocation2] sm:$0xff]  ;;  %vm72_vm1 = vcmask 261120   ;;  %vm162_vm2 = vcmask 523264   ;;  %s407_s11 = smov [#allocation8]  }
  0x27   :  { %283 = vmatprep.subr.mxu1 %v405_v0  ;;  %299 = vmatprep.mubr.msk.f32.mxu1 %vm406_vm0, %v405_v0  ;;  %v154_v6 = vld [vmem:[#allocation7 + $0x38] sm:$0xff]  ;;  %v153_v7 = vld [vmem:[#allocation7 + $0x30] sm:$0xff]  ;;  %v152_v8 = vld [vmem:[#allocation7 + $0x28] sm:$0xff]  ;;  %s244_s12 = sshll.u32 %s407_s11, 4  ;;  %s245_s12 = int_to_ptr.vmem [resolvable:$true] %s244_s12 }
  0x28   :  { %273 = vmatpush3.msra.mxu0 %v64_v1  ;;  %284 = vmatpush3.msra.mxu1 %v154_v6  ;;  %v151_v9 = vld [vmem:[#allocation7 + $0x20] sm:$0xff]  ;;  %v150_v10 = vld [vmem:[#allocation7 + $0x18] sm:$0xff]  ;;  %v149_v11 = vld [vmem:[#allocation7 + $0x10] sm:$0xff]  ;;  %p379_p2 = scmp.lt.s32.totalorder %s245_s12, %s245_s12 }
  0x29   :  { %274 = vmatprep.subr.mxu0 %v405_v0  ;;  %285 = vmatprep.subr.mxu1 %v405_v0  ;;  %v148_v12 = vld [vmem:[#allocation7 + $0x8] sm:$0xff]  ;;  %v147_v13 = vld [vmem:[#allocation7] sm:$0xff]  ;;  %v254_v14 = vld [vmem:[%s458_s2] ss:$0 sm:$0xff]  ;;  %s374_s2 = scalar_lea.vmem %s245_s12, 128 }
  0x2a   :  { %275 = vmatpush3.msra.mxu0 %v63_v2  ;;  %286 = vmatpush3.msra.mxu1 %v153_v7  ;;  %v256_v19 = vld [vmem:[%s460_s4] ss:$0 sm:$0xff]  ;;  %p375_p1 = scmp.ne.s32.totalorder %s245_s12, %s374_s2  ;;  %p380_p3 = scmp.lt.s32.totalorder %s374_s2, %s374_s2 }
  0x2b   :  { %276 = vmatprep.subr.mxu0 %v405_v0  ;;  %287 = vmatprep.subr.mxu1 %v405_v0 }
  0x2c   :  { %277 = vmatpush3.msra.mxu0 %v62_v3  ;;  %288 = vmatpush3.msra.mxu1 %v152_v8  ;;  %p381_p4 = por %p380_p3, %p379_p2 }
  0x2d   :  { %278 = vmatprep.subr.mxu0 %v405_v0  ;;  %289 = vmatprep.subr.mxu1 %v405_v0 }
  0x2e   :  { %279 = vmatpush3.msra.mxu0 %v61_v4  ;;  %290 = vmatpush3.msra.mxu1 %v151_v9  ;;  %p382_p5 = pnand %p381_p4, %p375_p1 }
  0x2f   :  { %281 = vmatmul.mubr.msk.f32.vlgmr.msra.gmra.mxu0 %vm72_vm1, %v60_v5  ;;  %291 = vmatprep.subr.mxu1 %v405_v0 }
  0x30   :  { %292 = vmatpush3.msra.mxu1 %v150_v10 }
  0x31   :  { %293 = vmatprep.subr.mxu1 %v405_v0 }
  0x32   :  { %294 = vmatpush3.msra.mxu1 %v149_v11 }
  0x33   :  { %295 = vmatprep.subr.mxu1 %v405_v0 }
  0x34   :  { %296 = vmatpush3.msra.mxu1 %v148_v12 }
  0x35   :  { %297 = vmatprep.subr.mxu1 %v405_v0 }
  0x36   :  { %298 = vmatpush3.msra.mxu1 %v147_v13 }
  0xef   :  { %v142_v15 = vpop.f32.mrf.mxu0 }
  0xf0   :  { %v143_v16 = vadd.f32 %v254_v14, %v142_v15 }
  0xf1   :  { %v282_v17 = vpop.f32.mrf.mxu0 }
  0xf2   :  { %310 = vtanh.f32 %v143_v16 }
  0xff   :  { %v311_v18 = vpop.eup %310 }
 0x100   :  { %300 = vmatmul.mubr.msk.f32.vlgmr.msra.gmra.mxu1 %vm162_vm2, %v311_v18 }
 0x1c0   :  { %v232_v20 = vpop.f32.mrf.mxu1 }
 0x1c1   :  { %v233_v21 = vadd.f32 %v256_v19, %v232_v20 }
 0x1c2   :  { %v301_v22 = vpop.f32.mrf.mxu1 }
 0x1c3   :  { %312 = vtanh.f32 %v233_v21 }
 0x1d0   :  { %v313_v23 = vpop.eup %312 }
 0x1d1   :  { %237 = vst [vmem:[#allocation8] sm:$0xff] %v313_v23 }
 0x1d2   :  { %385 = shalt.err (!%p382_p5)
}
 0x1d3   :  { %247 = dma.vmem_to_hbm [thread:$0]  %s245_s12, 128, %s461_s5, [#allocation4]  }
 0x1d4   :  { %398 = dma.done.wait [#allocation4], 128  }
 0x1d5   :  { %399 = vsyncadd [#allocation4], 4294967168 }
 0x1d6   :  { %251 = vsyncpa [#allocation3], 1 }
 0x1d7   :  { %252 = vsyncpa [#allocation6], 1 }
 0x1d8   :  { %253 = vsyncpa [#allocation4], 1 }

</bundles_post_ra>
